<compile_context>
chip_gen: v6e
topology: v6e:2x2x1
jax: 0.10.0
libtpu: 0.0.40
codegen_flags: <defaults>
</compile_context>

<pallas_src>
import functools
import math

import jax
import jax.numpy as jnp
import numpy as np
from jax.experimental import pallas as pl
from jax.experimental.pallas import tpu as pltpu


# ----------------------------------------------------------------------------
# Fused Pallas kernel: merged dual-stream QKV proj, per-head attention, proj.
# ----------------------------------------------------------------------------
def _attention_I_kernel(joint_ref, inter_ref, wqkv_ref, wout_ref, o_ref,
                        *, B, N, H, HS, C):
    f32 = jnp.float32
    Q0, K0, V0, L0 = 0, 2 * C, 4 * C, 5 * C   # packed column regions

    # Packed weights, loaded once.
    wqkv = wqkv_ref[...]
    wj_w = wqkv[0:C, :]                # joint-stream columns of packed weight
    wi_w = wqkv[C:2 * C, :]            # inter-stream columns of packed weight
    wout = wout_ref[...]
    w_p = wout[0:C, :]                 # proj weight^T (C, C)
    b_p = wout[C:C + 1, :]             # proj bias (1, C)

    # Merged dual-stream projection, one per batch (rows sublane-aligned at 0).
    projs = []
    for b in range(B):
        pj = (jnp.dot(joint_ref[b], wj_w, preferred_element_type=f32)
              + jnp.dot(inter_ref[b], wi_w, preferred_element_type=f32))
        projs.append(pj)               # (N, 5C + 16H)

    # Fused per-head logits: [Jq*s | Iq*s] @ [Jk | Ik]^T (+ precomputed I_conv
    # term). Contract dim 1 of both operands -> no materialized transpose.
    dn_nt = (((1,), (1,)), ((), ()))
    logit_blocks = []
    for b in range(B):
        pj = projs[b]
        for h in range(H):
            qh = pj[:, Q0 + 2 * HS * h: Q0 + 2 * HS * (h + 1)]   # (N, 2HS)
            kh = pj[:, K0 + 2 * HS * h: K0 + 2 * HS * (h + 1)]   # (N, 2HS)
            lin = pj[:, L0 + 16 * h: L0 + 16 * h + N]            # (N, N)
            logit_blocks.append(
                jax.lax.dot_general(qh, kh, dn_nt,
                                    preferred_element_type=f32) + lin)

    # TODO(synk): optional `mask` path (masked_fill with -1e9) not wired in;
    # the reference forward call uses mask=None.

    # One batched softmax over all B*H heads (stack on a new leading dim:
    # no lane/sublane shuffles, single max/exp/sum/recip pass).
    logits = jnp.stack(logit_blocks, axis=0)                     # (B*H, N, N)
    logits = logits - jnp.max(logits, axis=-1, keepdims=True)
    e = jnp.exp(logits)
    # Exact reciprocal keeps results within the 2e-4 f32 reference tolerance.
    p = e * pl.reciprocal(jnp.sum(e, axis=-1, keepdims=True), approx=False)
    # attn_drop / proj_drop are identity (p=0.0 / eval mode).

    # p @ J_v per head, register-assembled to (N, C), single final projection.
    outs = []
    for b in range(B):
        pj = projs[b]
        heads = [
            jnp.dot(p[b * H + h], pj[:, V0 + HS * h: V0 + HS * (h + 1)],
                    preferred_element_type=f32)
            for h in range(H)
        ]
        xb = jnp.concatenate(heads, axis=1)                      # (N, C)
        outs.append(jnp.dot(xb, w_p, preferred_element_type=f32) + b_p)

    o_ref[...] = jnp.stack(outs, axis=0).astype(o_ref.dtype)


def attention_I_forward(packed, joint_feature, interact_feature, num_heads):
    B, N, C = joint_feature.shape
    H = num_heads
    HS = C // H
    assert N == 15, "Attention_I requires N == 15 (I_conv width == attn width)"
    W = packed["w_qkv"].shape[1]

    kern = functools.partial(_attention_I_kernel, B=B, N=N, H=H, HS=HS, C=C)

    def full(shape):
        nd = len(shape)
        return pl.BlockSpec(shape, lambda i, nd=nd: (0,) * nd)

    out = pl.pallas_call(
        kern,
        out_shape=jax.ShapeDtypeStruct((B, N, C), jnp.float32),
        grid=(1,),
        in_specs=[
            full((B, N, C)),          # joint features
            full((B, N, C)),          # interact features
            full((2 * C, W)),         # packed [Wj_ext ; Wi_ext]
            full((C + 1, C)),         # packed [w_proj ; b_proj]
        ],
        out_specs=full((B, N, C)),
        compiler_params=pltpu.CompilerParams(
            dimension_semantics=("arbitrary",)),
    )(joint_feature, interact_feature, packed["w_qkv"], packed["w_out"])

    return out


# ----------------------------------------------------------------------------
# One-time parameter packing (host side, outside the hot path).
# Column layout of W_qkv (width 5C + 16H):
#   [0, 2C)      per-head 2HS blocks: [Jq*scale | Iq*scale]
#   [2C, 4C)     per-head 2HS blocks: [Jk | Ik]
#   [4C, 5C)     per-head HS blocks:  Jv
#   [5C, 5C+16H) per-head 16-col blocks (15 used): W_iqk_v_h @ (W_iconv*scale)
# Rows [0,C) hold the joint-stream (J_qkv) contribution, rows [C,2C) the
# interact-stream (I_qk) contribution; unused entries are zero.
# ----------------------------------------------------------------------------
def pack_params(params, num_heads):
    w_j = np.asarray(params["w_jqkv"], np.float32)    # (C, 3C)
    w_i = np.asarray(params["w_iqk"], np.float32)     # (C, 3C)
    w_c = np.asarray(params["w_iconv"], np.float32)   # (HS, 15)
    w_p = np.asarray(params["w_proj"], np.float32)    # (C, C)
    b_p = np.asarray(params["b_proj"], np.float32)    # (1, C)

    C = w_p.shape[0]
    H = num_heads
    HS = C // H
    scale = HS ** (-0.5)
    W = 5 * C + 16 * H
    Q0, K0, V0, L0 = 0, 2 * C, 4 * C, 5 * C

    wj_ext = np.zeros((C, W), np.float32)
    wi_ext = np.zeros((C, W), np.float32)
    wc_s = w_c * scale
    for h in range(H):
        q = slice(HS * h, HS * (h + 1))
        k = slice(C + HS * h, C + HS * (h + 1))
        v = slice(2 * C + HS * h, 2 * C + HS * (h + 1))
        wj_ext[:, Q0 + 2 * HS * h: Q0 + 2 * HS * h + HS] = w_j[:, q] * scale
        wi_ext[:, Q0 + 2 * HS * h + HS: Q0 + 2 * HS * (h + 1)] = w_i[:, q] * scale
        wj_ext[:, K0 + 2 * HS * h: K0 + 2 * HS * h + HS] = w_j[:, k]
        wi_ext[:, K0 + 2 * HS * h + HS: K0 + 2 * HS * (h + 1)] = w_i[:, k]
        wj_ext[:, V0 + HS * h: V0 + HS * (h + 1)] = w_j[:, v]
        wi_ext[:, L0 + 16 * h: L0 + 16 * h + 15] = w_i[:, v] @ wc_s

    return dict(
        w_qkv=jnp.asarray(np.concatenate([wj_ext, wi_ext], axis=0)),  # (2C, W)
        w_out=jnp.asarray(np.concatenate([w_p, b_p], axis=0)),        # (C+1, C)
    )


# ----------------------------------------------------------------------------
# Parameters (deterministic synthetic init; qkv_bias=False, proj has bias)
# ----------------------------------------------------------------------------
def init_params(key, dim, num_heads):
    head_dim = dim // num_heads
    ks = jax.random.split(key, 5)

    def w(k, fan_in, shape):
        return (jax.random.normal(k, shape, jnp.float32)
                * (1.0 / math.sqrt(fan_in)))

    return dict(
        w_jqkv=w(ks[0], dim, (dim, 3 * dim)),        # J_qkv.weight^T
        w_iqk=w(ks[1], dim, (dim, 3 * dim)),         # I_qk.weight^T
        w_iconv=w(ks[2], head_dim, (head_dim, 15)),  # I_conv.weight^T
        w_proj=w(ks[3], dim, (dim, dim)),            # proj.weight^T
        b_proj=w(ks[4], dim, (1, dim)),              # proj.bias
    )


# ----------------------------------------------------------------------------
# Pure-JAX reference (uses the ORIGINAL, unpacked params)
# ----------------------------------------------------------------------------
def reference(params, joint, inter, num_heads):
    B, N, C = joint.shape
    H = num_heads
    HS = C // H
    scale = HS ** (-0.5)
    jqkv = (joint @ params["w_jqkv"]).reshape(B, N, 3, H, HS).transpose(
        2, 0, 3, 1, 4)
    iqkv = (inter @ params["w_iqk"]).reshape(B, N, 3, H, HS).transpose(
        2, 0, 3, 1, 4)
    jq, jk, jv = jqkv[0], jqkv[1], jqkv[2]
    iq, ik, iv = iqkv[0], iqkv[1], iqkv[2]
    attn = (jnp.einsum("bhnd,bhmd->bhnm", jq, jk)
            + jnp.einsum("bhnd,bhmd->bhnm", iq, ik)
            + iv @ params["w_iconv"]) * scale
    attn = jax.nn.softmax(attn, axis=-1)
    x = jnp.einsum("bhnm,bhmd->bhnd", attn, jv).transpose(0, 2, 1, 3).reshape(
        B, N, C)
    return x @ params["w_proj"] + params["b_proj"][0]


if __name__ == "__main__":
    key = jax.random.PRNGKey(0)
    B, N = 2, 15          # N must be 15 (I_conv outputs 15 == attention width)
    dim, num_heads = 32, 4
    k1, k2, k3 = jax.random.split(key, 3)
    joint = jax.random.normal(k1, (B, N, dim), jnp.float32)
    inter = jax.random.normal(k2, (B, N, dim), jnp.float32)
    params = init_params(k3, dim, num_heads)
    packed = pack_params(params, num_heads)   # one-time param prep

    fwd = jax.jit(functools.partial(attention_I_forward, num_heads=num_heads))
    out = jax.block_until_ready(fwd(packed, joint, inter))

    ref = jax.block_until_ready(reference(params, joint, inter, num_heads))
    np.testing.assert_allclose(np.asarray(out), np.asarray(ref),
                               rtol=2e-4, atol=2e-4)
    print("KERNEL_OK")
</pallas_src>

<mosaic_0001>
module attributes {stable_mosaic.version = 11 : i64} {
  func.func @_attention_I_kernel(%arg0: i32, %arg1: memref<2x15x32xf32, #tpu.memory_space<vmem>>, %arg2: memref<2x15x32xf32, #tpu.memory_space<vmem>>, %arg3: memref<64x224xf32, #tpu.memory_space<vmem>>, %arg4: memref<33x32xf32, #tpu.memory_space<vmem>>, %arg5: memref<2x15x32xf32, #tpu.memory_space<vmem>>) attributes {dimension_semantics = [#tpu.dimension_semantics<arbitrary>], iteration_bounds = array<i64: 1>, scalar_prefetch = 0 : i64, scratch_operands = 0 : i64, tpu.core_type = #tpu.core_type<tc>, window_params = [{pipeline_mode = #tpu.pipeline_mode<synchronous>, transform_indices = @transform_0, window_bounds = array<i64: 2, 15, 32>}, {pipeline_mode = #tpu.pipeline_mode<synchronous>, transform_indices = @transform_1, window_bounds = array<i64: 2, 15, 32>}, {pipeline_mode = #tpu.pipeline_mode<synchronous>, transform_indices = @transform_2, window_bounds = array<i64: 64, 224>}, {pipeline_mode = #tpu.pipeline_mode<synchronous>, transform_indices = @transform_3, window_bounds = array<i64: 33, 32>}, {pipeline_mode = #tpu.pipeline_mode<synchronous>, transform_indices = @transform_4, window_bounds = array<i64: 2, 15, 32>}]} {
    %c0 = arith.constant 0 : index
    %c0_0 = arith.constant 0 : index
    %0 = vector.load %arg3[%c0, %c0_0] : memref<64x224xf32, #tpu.memory_space<vmem>>, vector<64x224xf32>
    %1 = vector.extract_strided_slice %0 {offsets = [0, 0], sizes = [32, 224], strides = [1, 1]} : vector<64x224xf32> to vector<32x224xf32>
    %2 = vector.extract_strided_slice %0 {offsets = [32, 0], sizes = [32, 224], strides = [1, 1]} : vector<64x224xf32> to vector<32x224xf32>
    %c0_1 = arith.constant 0 : index
    %c0_2 = arith.constant 0 : index
    %3 = vector.load %arg4[%c0_1, %c0_2] : memref<33x32xf32, #tpu.memory_space<vmem>>, vector<33x32xf32>
    %4 = vector.extract_strided_slice %3 {offsets = [0, 0], sizes = [32, 32], strides = [1, 1]} : vector<33x32xf32> to vector<32x32xf32>
    %5 = vector.extract_strided_slice %3 {offsets = [32, 0], sizes = [1, 32], strides = [1, 1]} : vector<33x32xf32> to vector<1x32xf32>
    %c0_3 = arith.constant 0 : index
    %c0_4 = arith.constant 0 : index
    %c0_5 = arith.constant 0 : index
    %6 = vector.load %arg1[%c0_3, %c0_4, %c0_5] : memref<2x15x32xf32, #tpu.memory_space<vmem>>, vector<1x15x32xf32>
    %7 = vector.shape_cast %6 : vector<1x15x32xf32> to vector<15x32xf32>
    %cst = arith.constant dense<0.000000e+00> : vector<15x224xf32>
    %8 = tpu.matmul %7, %1, %cst {dimension_numbers = #tpu.dot_dimension_numbers<[1], [0], [0], [1], [0, 0, 1, 1], [], []>} : vector<15x32xf32>, vector<32x224xf32>, vector<15x224xf32> -> vector<15x224xf32>
    %c0_6 = arith.constant 0 : index
    %c0_7 = arith.constant 0 : index
    %c0_8 = arith.constant 0 : index
    %9 = vector.load %arg2[%c0_6, %c0_7, %c0_8] : memref<2x15x32xf32, #tpu.memory_space<vmem>>, vector<1x15x32xf32>
    %10 = vector.shape_cast %9 : vector<1x15x32xf32> to vector<15x32xf32>
    %cst_9 = arith.constant dense<0.000000e+00> : vector<15x224xf32>
    %11 = tpu.matmul %10, %2, %cst_9 {dimension_numbers = #tpu.dot_dimension_numbers<[1], [0], [0], [1], [0, 0, 1, 1], [], []>} : vector<15x32xf32>, vector<32x224xf32>, vector<15x224xf32> -> vector<15x224xf32>
    %12 = arith.addf %8, %11 : vector<15x224xf32>
    %c1 = arith.constant 1 : index
    %c0_10 = arith.constant 0 : index
    %c0_11 = arith.constant 0 : index
    %13 = vector.load %arg1[%c1, %c0_10, %c0_11] : memref<2x15x32xf32, #tpu.memory_space<vmem>>, vector<1x15x32xf32>
    %14 = vector.shape_cast %13 : vector<1x15x32xf32> to vector<15x32xf32>
    %cst_12 = arith.constant dense<0.000000e+00> : vector<15x224xf32>
    %15 = tpu.matmul %14, %1, %cst_12 {dimension_numbers = #tpu.dot_dimension_numbers<[1], [0], [0], [1], [0, 0, 1, 1], [], []>} : vector<15x32xf32>, vector<32x224xf32>, vector<15x224xf32> -> vector<15x224xf32>
    %c1_13 = arith.constant 1 : index
    %c0_14 = arith.constant 0 : index
    %c0_15 = arith.constant 0 : index
    %16 = vector.load %arg2[%c1_13, %c0_14, %c0_15] : memref<2x15x32xf32, #tpu.memory_space<vmem>>, vector<1x15x32xf32>
    %17 = vector.shape_cast %16 : vector<1x15x32xf32> to vector<15x32xf32>
    %cst_16 = arith.constant dense<0.000000e+00> : vector<15x224xf32>
    %18 = tpu.matmul %17, %2, %cst_16 {dimension_numbers = #tpu.dot_dimension_numbers<[1], [0], [0], [1], [0, 0, 1, 1], [], []>} : vector<15x32xf32>, vector<32x224xf32>, vector<15x224xf32> -> vector<15x224xf32>
    %19 = arith.addf %15, %18 : vector<15x224xf32>
    %20 = vector.extract_strided_slice %12 {offsets = [0, 0], sizes = [15, 16], strides = [1, 1]} : vector<15x224xf32> to vector<15x16xf32>
    %21 = vector.extract_strided_slice %12 {offsets = [0, 64], sizes = [15, 16], strides = [1, 1]} : vector<15x224xf32> to vector<15x16xf32>
    %22 = vector.extract_strided_slice %12 {offsets = [0, 160], sizes = [15, 15], strides = [1, 1]} : vector<15x224xf32> to vector<15x15xf32>
    %cst_17 = arith.constant dense<0.000000e+00> : vector<15x15xf32>
    %23 = tpu.matmul %20, %21, %cst_17 {dimension_numbers = #tpu.dot_dimension_numbers<[1], [1], [0], [0], [0, 0, 1, 0], [], []>} : vector<15x16xf32>, vector<15x16xf32>, vector<15x15xf32> -> vector<15x15xf32>
    %24 = arith.addf %23, %22 : vector<15x15xf32>
    %25 = vector.extract_strided_slice %12 {offsets = [0, 16], sizes = [15, 16], strides = [1, 1]} : vector<15x224xf32> to vector<15x16xf32>
    %26 = vector.extract_strided_slice %12 {offsets = [0, 80], sizes = [15, 16], strides = [1, 1]} : vector<15x224xf32> to vector<15x16xf32>
    %27 = vector.extract_strided_slice %12 {offsets = [0, 176], sizes = [15, 15], strides = [1, 1]} : vector<15x224xf32> to vector<15x15xf32>
    %cst_18 = arith.constant dense<0.000000e+00> : vector<15x15xf32>
    %28 = tpu.matmul %25, %26, %cst_18 {dimension_numbers = #tpu.dot_dimension_numbers<[1], [1], [0], [0], [0, 0, 1, 0], [], []>} : vector<15x16xf32>, vector<15x16xf32>, vector<15x15xf32> -> vector<15x15xf32>
    %29 = arith.addf %28, %27 : vector<15x15xf32>
    %30 = vector.extract_strided_slice %12 {offsets = [0, 32], sizes = [15, 16], strides = [1, 1]} : vector<15x224xf32> to vector<15x16xf32>
    %31 = vector.extract_strided_slice %12 {offsets = [0, 96], sizes = [15, 16], strides = [1, 1]} : vector<15x224xf32> to vector<15x16xf32>
    %32 = vector.extract_strided_slice %12 {offsets = [0, 192], sizes = [15, 15], strides = [1, 1]} : vector<15x224xf32> to vector<15x15xf32>
    %cst_19 = arith.constant dense<0.000000e+00> : vector<15x15xf32>
    %33 = tpu.matmul %30, %31, %cst_19 {dimension_numbers = #tpu.dot_dimension_numbers<[1], [1], [0], [0], [0, 0, 1, 0], [], []>} : vector<15x16xf32>, vector<15x16xf32>, vector<15x15xf32> -> vector<15x15xf32>
    %34 = arith.addf %33, %32 : vector<15x15xf32>
    %35 = vector.extract_strided_slice %12 {offsets = [0, 48], sizes = [15, 16], strides = [1, 1]} : vector<15x224xf32> to vector<15x16xf32>
    %36 = vector.extract_strided_slice %12 {offsets = [0, 112], sizes = [15, 16], strides = [1, 1]} : vector<15x224xf32> to vector<15x16xf32>
    %37 = vector.extract_strided_slice %12 {offsets = [0, 208], sizes = [15, 15], strides = [1, 1]} : vector<15x224xf32> to vector<15x15xf32>
    %cst_20 = arith.constant dense<0.000000e+00> : vector<15x15xf32>
    %38 = tpu.matmul %35, %36, %cst_20 {dimension_numbers = #tpu.dot_dimension_numbers<[1], [1], [0], [0], [0, 0, 1, 0], [], []>} : vector<15x16xf32>, vector<15x16xf32>, vector<15x15xf32> -> vector<15x15xf32>
    %39 = arith.addf %38, %37 : vector<15x15xf32>
    %40 = vector.extract_strided_slice %19 {offsets = [0, 0], sizes = [15, 16], strides = [1, 1]} : vector<15x224xf32> to vector<15x16xf32>
    %41 = vector.extract_strided_slice %19 {offsets = [0, 64], sizes = [15, 16], strides = [1, 1]} : vector<15x224xf32> to vector<15x16xf32>
    %42 = vector.extract_strided_slice %19 {offsets = [0, 160], sizes = [15, 15], strides = [1, 1]} : vector<15x224xf32> to vector<15x15xf32>
    %cst_21 = arith.constant dense<0.000000e+00> : vector<15x15xf32>
    %43 = tpu.matmul %40, %41, %cst_21 {dimension_numbers = #tpu.dot_dimension_numbers<[1], [1], [0], [0], [0, 0, 1, 0], [], []>} : vector<15x16xf32>, vector<15x16xf32>, vector<15x15xf32> -> vector<15x15xf32>
    %44 = arith.addf %43, %42 : vector<15x15xf32>
    %45 = vector.extract_strided_slice %19 {offsets = [0, 16], sizes = [15, 16], strides = [1, 1]} : vector<15x224xf32> to vector<15x16xf32>
    %46 = vector.extract_strided_slice %19 {offsets = [0, 80], sizes = [15, 16], strides = [1, 1]} : vector<15x224xf32> to vector<15x16xf32>
    %47 = vector.extract_strided_slice %19 {offsets = [0, 176], sizes = [15, 15], strides = [1, 1]} : vector<15x224xf32> to vector<15x15xf32>
    %cst_22 = arith.constant dense<0.000000e+00> : vector<15x15xf32>
    %48 = tpu.matmul %45, %46, %cst_22 {dimension_numbers = #tpu.dot_dimension_numbers<[1], [1], [0], [0], [0, 0, 1, 0], [], []>} : vector<15x16xf32>, vector<15x16xf32>, vector<15x15xf32> -> vector<15x15xf32>
    %49 = arith.addf %48, %47 : vector<15x15xf32>
    %50 = vector.extract_strided_slice %19 {offsets = [0, 32], sizes = [15, 16], strides = [1, 1]} : vector<15x224xf32> to vector<15x16xf32>
    %51 = vector.extract_strided_slice %19 {offsets = [0, 96], sizes = [15, 16], strides = [1, 1]} : vector<15x224xf32> to vector<15x16xf32>
    %52 = vector.extract_strided_slice %19 {offsets = [0, 192], sizes = [15, 15], strides = [1, 1]} : vector<15x224xf32> to vector<15x15xf32>
    %cst_23 = arith.constant dense<0.000000e+00> : vector<15x15xf32>
    %53 = tpu.matmul %50, %51, %cst_23 {dimension_numbers = #tpu.dot_dimension_numbers<[1], [1], [0], [0], [0, 0, 1, 0], [], []>} : vector<15x16xf32>, vector<15x16xf32>, vector<15x15xf32> -> vector<15x15xf32>
    %54 = arith.addf %53, %52 : vector<15x15xf32>
    %55 = vector.extract_strided_slice %19 {offsets = [0, 48], sizes = [15, 16], strides = [1, 1]} : vector<15x224xf32> to vector<15x16xf32>
    %56 = vector.extract_strided_slice %19 {offsets = [0, 112], sizes = [15, 16], strides = [1, 1]} : vector<15x224xf32> to vector<15x16xf32>
    %57 = vector.extract_strided_slice %19 {offsets = [0, 208], sizes = [15, 15], strides = [1, 1]} : vector<15x224xf32> to vector<15x15xf32>
    %cst_24 = arith.constant dense<0.000000e+00> : vector<15x15xf32>
    %58 = tpu.matmul %55, %56, %cst_24 {dimension_numbers = #tpu.dot_dimension_numbers<[1], [1], [0], [0], [0, 0, 1, 0], [], []>} : vector<15x16xf32>, vector<15x16xf32>, vector<15x15xf32> -> vector<15x15xf32>
    %59 = arith.addf %58, %57 : vector<15x15xf32>
    %60 = vector.shape_cast %24 : vector<15x15xf32> to vector<1x15x15xf32>
    %61 = vector.shape_cast %29 : vector<15x15xf32> to vector<1x15x15xf32>
    %62 = vector.shape_cast %34 : vector<15x15xf32> to vector<1x15x15xf32>
    %63 = vector.shape_cast %39 : vector<15x15xf32> to vector<1x15x15xf32>
    %64 = vector.shape_cast %44 : vector<15x15xf32> to vector<1x15x15xf32>
    %65 = vector.shape_cast %49 : vector<15x15xf32> to vector<1x15x15xf32>
    %66 = vector.shape_cast %54 : vector<15x15xf32> to vector<1x15x15xf32>
    %67 = vector.shape_cast %59 : vector<15x15xf32> to vector<1x15x15xf32>
    %68 = tpu.concatenate %60, %61, %62, %63, %64, %65, %66, %67 in 0 : vector<1x15x15xf32>, vector<1x15x15xf32>, vector<1x15x15xf32>, vector<1x15x15xf32>, vector<1x15x15xf32>, vector<1x15x15xf32>, vector<1x15x15xf32>, vector<1x15x15xf32> -> vector<8x15x15xf32>
    %cst_25 = arith.constant dense<0xFF800000> : vector<8x15xf32>
    %69 = vector.multi_reduction <maximumf>, %68, %cst_25 [2] : vector<8x15x15xf32> to vector<8x15xf32>
    %70 = vector.shape_cast %69 : vector<8x15xf32> to vector<8x15x1xf32>
    %71 = vector.broadcast %70 : vector<8x15x1xf32> to vector<8x15x15xf32>
    %72 = arith.subf %68, %71 : vector<8x15x15xf32>
    %73 = math.exp %72 : vector<8x15x15xf32>
    %cst_26 = arith.constant dense<0.000000e+00> : vector<8x15xf32>
    %74 = vector.multi_reduction <add>, %73, %cst_26 [2] : vector<8x15x15xf32> to vector<8x15xf32>
    %75 = vector.shape_cast %74 : vector<8x15xf32> to vector<8x15x1xf32>
    %76 = tpu.reciprocal %75 : vector<8x15x1xf32> -> vector<8x15x1xf32>
    %77 = vector.broadcast %76 : vector<8x15x1xf32> to vector<8x15x15xf32>
    %78 = arith.mulf %73, %77 : vector<8x15x15xf32>
    %79 = vector.extract_strided_slice %78 {offsets = [0, 0, 0], sizes = [1, 15, 15], strides = [1, 1, 1]} : vector<8x15x15xf32> to vector<1x15x15xf32>
    %80 = vector.shape_cast %79 : vector<1x15x15xf32> to vector<15x15xf32>
    %81 = vector.extract_strided_slice %12 {offsets = [0, 128], sizes = [15, 8], strides = [1, 1]} : vector<15x224xf32> to vector<15x8xf32>
    %cst_27 = arith.constant dense<0.000000e+00> : vector<15x8xf32>
    %82 = tpu.matmul %80, %81, %cst_27 {dimension_numbers = #tpu.dot_dimension_numbers<[1], [0], [0], [1], [0, 0, 1, 1], [], []>} : vector<15x15xf32>, vector<15x8xf32>, vector<15x8xf32> -> vector<15x8xf32>
    %83 = vector.extract_strided_slice %78 {offsets = [1, 0, 0], sizes = [1, 15, 15], strides = [1, 1, 1]} : vector<8x15x15xf32> to vector<1x15x15xf32>
    %84 = vector.shape_cast %83 : vector<1x15x15xf32> to vector<15x15xf32>
    %85 = vector.extract_strided_slice %12 {offsets = [0, 136], sizes = [15, 8], strides = [1, 1]} : vector<15x224xf32> to vector<15x8xf32>
    %cst_28 = arith.constant dense<0.000000e+00> : vector<15x8xf32>
    %86 = tpu.matmul %84, %85, %cst_28 {dimension_numbers = #tpu.dot_dimension_numbers<[1], [0], [0], [1], [0, 0, 1, 1], [], []>} : vector<15x15xf32>, vector<15x8xf32>, vector<15x8xf32> -> vector<15x8xf32>
    %87 = vector.extract_strided_slice %78 {offsets = [2, 0, 0], sizes = [1, 15, 15], strides = [1, 1, 1]} : vector<8x15x15xf32> to vector<1x15x15xf32>
    %88 = vector.shape_cast %87 : vector<1x15x15xf32> to vector<15x15xf32>
    %89 = vector.extract_strided_slice %12 {offsets = [0, 144], sizes = [15, 8], strides = [1, 1]} : vector<15x224xf32> to vector<15x8xf32>
    %cst_29 = arith.constant dense<0.000000e+00> : vector<15x8xf32>
    %90 = tpu.matmul %88, %89, %cst_29 {dimension_numbers = #tpu.dot_dimension_numbers<[1], [0], [0], [1], [0, 0, 1, 1], [], []>} : vector<15x15xf32>, vector<15x8xf32>, vector<15x8xf32> -> vector<15x8xf32>
    %91 = vector.extract_strided_slice %78 {offsets = [3, 0, 0], sizes = [1, 15, 15], strides = [1, 1, 1]} : vector<8x15x15xf32> to vector<1x15x15xf32>
    %92 = vector.shape_cast %91 : vector<1x15x15xf32> to vector<15x15xf32>
    %93 = vector.extract_strided_slice %12 {offsets = [0, 152], sizes = [15, 8], strides = [1, 1]} : vector<15x224xf32> to vector<15x8xf32>
    %cst_30 = arith.constant dense<0.000000e+00> : vector<15x8xf32>
    %94 = tpu.matmul %92, %93, %cst_30 {dimension_numbers = #tpu.dot_dimension_numbers<[1], [0], [0], [1], [0, 0, 1, 1], [], []>} : vector<15x15xf32>, vector<15x8xf32>, vector<15x8xf32> -> vector<15x8xf32>
    %95 = tpu.concatenate %82, %86, %90, %94 in 1 : vector<15x8xf32>, vector<15x8xf32>, vector<15x8xf32>, vector<15x8xf32> -> vector<15x32xf32>
    %cst_31 = arith.constant dense<0.000000e+00> : vector<15x32xf32>
    %96 = tpu.matmul %95, %4, %cst_31 {dimension_numbers = #tpu.dot_dimension_numbers<[1], [0], [0], [1], [0, 0, 1, 1], [], []>} : vector<15x32xf32>, vector<32x32xf32>, vector<15x32xf32> -> vector<15x32xf32>
    %97 = vector.broadcast %5 : vector<1x32xf32> to vector<15x32xf32>
    %98 = arith.addf %96, %97 : vector<15x32xf32>
    %99 = vector.extract_strided_slice %78 {offsets = [4, 0, 0], sizes = [1, 15, 15], strides = [1, 1, 1]} : vector<8x15x15xf32> to vector<1x15x15xf32>
    %100 = vector.shape_cast %99 : vector<1x15x15xf32> to vector<15x15xf32>
    %101 = vector.extract_strided_slice %19 {offsets = [0, 128], sizes = [15, 8], strides = [1, 1]} : vector<15x224xf32> to vector<15x8xf32>
    %cst_32 = arith.constant dense<0.000000e+00> : vector<15x8xf32>
    %102 = tpu.matmul %100, %101, %cst_32 {dimension_numbers = #tpu.dot_dimension_numbers<[1], [0], [0], [1], [0, 0, 1, 1], [], []>} : vector<15x15xf32>, vector<15x8xf32>, vector<15x8xf32> -> vector<15x8xf32>
    %103 = vector.extract_strided_slice %78 {offsets = [5, 0, 0], sizes = [1, 15, 15], strides = [1, 1, 1]} : vector<8x15x15xf32> to vector<1x15x15xf32>
    %104 = vector.shape_cast %103 : vector<1x15x15xf32> to vector<15x15xf32>
    %105 = vector.extract_strided_slice %19 {offsets = [0, 136], sizes = [15, 8], strides = [1, 1]} : vector<15x224xf32> to vector<15x8xf32>
    %cst_33 = arith.constant dense<0.000000e+00> : vector<15x8xf32>
    %106 = tpu.matmul %104, %105, %cst_33 {dimension_numbers = #tpu.dot_dimension_numbers<[1], [0], [0], [1], [0, 0, 1, 1], [], []>} : vector<15x15xf32>, vector<15x8xf32>, vector<15x8xf32> -> vector<15x8xf32>
    %107 = vector.extract_strided_slice %78 {offsets = [6, 0, 0], sizes = [1, 15, 15], strides = [1, 1, 1]} : vector<8x15x15xf32> to vector<1x15x15xf32>
    %108 = vector.shape_cast %107 : vector<1x15x15xf32> to vector<15x15xf32>
    %109 = vector.extract_strided_slice %19 {offsets = [0, 144], sizes = [15, 8], strides = [1, 1]} : vector<15x224xf32> to vector<15x8xf32>
    %cst_34 = arith.constant dense<0.000000e+00> : vector<15x8xf32>
    %110 = tpu.matmul %108, %109, %cst_34 {dimension_numbers = #tpu.dot_dimension_numbers<[1], [0], [0], [1], [0, 0, 1, 1], [], []>} : vector<15x15xf32>, vector<15x8xf32>, vector<15x8xf32> -> vector<15x8xf32>
    %111 = vector.extract_strided_slice %78 {offsets = [7, 0, 0], sizes = [1, 15, 15], strides = [1, 1, 1]} : vector<8x15x15xf32> to vector<1x15x15xf32>
    %112 = vector.shape_cast %111 : vector<1x15x15xf32> to vector<15x15xf32>
    %113 = vector.extract_strided_slice %19 {offsets = [0, 152], sizes = [15, 8], strides = [1, 1]} : vector<15x224xf32> to vector<15x8xf32>
    %cst_35 = arith.constant dense<0.000000e+00> : vector<15x8xf32>
    %114 = tpu.matmul %112, %113, %cst_35 {dimension_numbers = #tpu.dot_dimension_numbers<[1], [0], [0], [1], [0, 0, 1, 1], [], []>} : vector<15x15xf32>, vector<15x8xf32>, vector<15x8xf32> -> vector<15x8xf32>
    %115 = tpu.concatenate %102, %106, %110, %114 in 1 : vector<15x8xf32>, vector<15x8xf32>, vector<15x8xf32>, vector<15x8xf32> -> vector<15x32xf32>
    %cst_36 = arith.constant dense<0.000000e+00> : vector<15x32xf32>
    %116 = tpu.matmul %115, %4, %cst_36 {dimension_numbers = #tpu.dot_dimension_numbers<[1], [0], [0], [1], [0, 0, 1, 1], [], []>} : vector<15x32xf32>, vector<32x32xf32>, vector<15x32xf32> -> vector<15x32xf32>
    %117 = vector.broadcast %5 : vector<1x32xf32> to vector<15x32xf32>
    %118 = arith.addf %116, %117 : vector<15x32xf32>
    %119 = vector.shape_cast %98 : vector<15x32xf32> to vector<1x15x32xf32>
    %120 = vector.shape_cast %118 : vector<15x32xf32> to vector<1x15x32xf32>
    %121 = tpu.concatenate %119, %120 in 0 : vector<1x15x32xf32>, vector<1x15x32xf32> -> vector<2x15x32xf32>
    %c0_37 = arith.constant 0 : index
    %c0_38 = arith.constant 0 : index
    %c0_39 = arith.constant 0 : index
    %122 = vector.load %arg5[%c0_37, %c0_38, %c0_39] : memref<2x15x32xf32, #tpu.memory_space<vmem>>, vector<2x15x32xf32>
    tpu.vector_store %arg5[%c0_37, %c0_38, %c0_39], %121 {strides = array<i32>} : memref<2x15x32xf32, #tpu.memory_space<vmem>>, vector<2x15x32xf32>,
    return
  }
  func.func @transform_0(%arg0: i32) -> (i32, i32, i32) {
    %c0_i32 = arith.constant 0 : i32
    %c0_i32_0 = arith.constant 0 : i32
    %c0_i32_1 = arith.constant 0 : i32
    %c0_i32_2 = arith.constant 0 : i32
    return %c0_i32, %c0_i32_0, %c0_i32_1 : i32, i32, i32
  }
  func.func @transform_1(%arg0: i32) -> (i32, i32, i32) {
    %c0_i32 = arith.constant 0 : i32
    %c0_i32_0 = arith.constant 0 : i32
    %c0_i32_1 = arith.constant 0 : i32
    %c0_i32_2 = arith.constant 0 : i32
    return %c0_i32, %c0_i32_0, %c0_i32_1 : i32, i32, i32
  }
  func.func @transform_2(%arg0: i32) -> (i32, i32) {
    %c0_i32 = arith.constant 0 : i32
    %c0_i32_0 = arith.constant 0 : i32
    %c0_i32_1 = arith.constant 0 : i32
    return %c0_i32, %c0_i32_0 : i32, i32
  }
  func.func @transform_3(%arg0: i32) -> (i32, i32) {
    %c0_i32 = arith.constant 0 : i32
    %c0_i32_0 = arith.constant 0 : i32
    %c0_i32_1 = arith.constant 0 : i32
    return %c0_i32, %c0_i32_0 : i32, i32
  }
  func.func @transform_4(%arg0: i32) -> (i32, i32, i32) {
    %c0_i32 = arith.constant 0 : i32
    %c0_i32_0 = arith.constant 0 : i32
    %c0_i32_1 = arith.constant 0 : i32
    %c0_i32_2 = arith.constant 0 : i32
    return %c0_i32, %c0_i32_0, %c0_i32_1 : i32, i32, i32
  }
}

</mosaic_0001>

<bundles_post_ra>
// kernel: attention_I_forward.1
= control target key start
LH: loop header
LB: loop body
LE: loop exit
PB: predicated region body
PF: predicated region fallthrough
CT: control target
= control target key end

     0   :  { %v2627_v3 = vmov 0.0   ;;  %vm42_vm0 = vcmask 261120   ;;  %vm395_vm1 = vcmask 130048   ;;  %s2628_s10 = smov 32   ;;  %s2629_s11 = smov 64   ;;  %vm1342_vm2 = vcmask 1046528   ;;  %s3178_s2 = inlined_call_operand.vmem [shape: f32[64,224], index: 2, kind: input, shape index: {}]   ;;  %s3179_s1 = inlined_call_operand.vmem [shape: f32[2,15,32], index: 1, kind: input, shape index: {}]   ;;  %s3180_s0 = inlined_call_operand.vmem [shape: f32[2,15,32], index: 0, kind: input, shape index: {}]   ;;  %s3181_s3 = inlined_call_operand.vmem [shape: f32[33,32], index: 3, kind: input, shape index: {}]   ;;  %s3182_s4 = inlined_call_operand.vmem [shape: f32[2,15,32], index: 4, kind: output, shape index: {}]  }
   0x1   :  { %v32_v0 = vld [vmem:[%s3178_s2 + $0x78] sm:$0xff]  ;;  %v31_v2 = vld [vmem:[%s3178_s2 + $0x70] sm:$0xff]  ;;  %113 = vmatprep.mubr.f32.mxu0 %v2627_v3  ;;  %196 = vmatprep.mubr.f32.mxu1 %v2627_v3  ;;  %v30_v5 = vld [vmem:[%s3178_s2 + $0x68] sm:$0xff]  ;;  %s2632_s12 = smov 16   ;;  %s2633_s13 = smov 96   ;;  %vm1162_vm3 = vcmask 120832  }
   0x2   :  { %v24_v1 = vld [vmem:[%s3178_s2 + $0x38] sm:$0xff]  ;;  %73 = vmatprep.subr.mxu0 %v32_v0  ;;  %v23_v4 = vld [vmem:[%s3178_s2 + $0x30] sm:$0xff]  ;;  %v22_v6 = vld [vmem:[%s3178_s2 + $0x28] sm:$0xff]  ;;  %s2634_s14 = smov 80   ;;  %vm1158_vm4 = vcmask 121856   ;;  %s2635_s15 = smov 120  }
   0x3   :  { %156 = vmatprep.subr.mxu1 %v24_v1  ;;  %74 = vmatpush1.msra.mxu0 %v31_v2  ;;  %v29_v7 = vld [vmem:[%s3178_s2 + $0x60] sm:$0xff]  ;;  %v28_v9 = vld [vmem:[%s3178_s2 + $0x58] sm:$0xff]  ;;  %v27_v11 = vld [vmem:[%s3178_s2 + $0x50] sm:$0xff]  ;;  %s2636_s16 = smov 104   ;;  %s2638_s25 = smov 24   ;;  %vm1708_vm5 = vcmask 64512  }
   0x4   :  { %157 = vmatpush1.msra.mxu1 %v23_v4  ;;  %v21_v8 = vld [vmem:[%s3178_s2 + $0x20] sm:$0xff]  ;;  %75 = vmatprep.subr.mxu0 %v30_v5  ;;  %v20_v10 = vld [vmem:[%s3178_s2 + $0x18] sm:$0xff]  ;;  %v19_v12 = vld [vmem:[%s3178_s2 + $0x10] sm:$0xff]  ;;  %vm1713_vm6 = vcmask 195584   ;;  %vm2260_vm7 = vcmask 260096  }
   0x5   :  { %158 = vmatprep.subr.mxu1 %v22_v6  ;;  %76 = vmatpush1.msra.mxu0 %v29_v7  ;;  %v26_v13 = vld [vmem:[%s3178_s2 + $0x48] sm:$0xff]  ;;  %v25_v15 = vld [vmem:[%s3178_s2 + $0x40] sm:$0xff]  ;;  %v2274_v21 = vld [vmem:[%s3179_s1 + $0x10] sm:$0xff] }
   0x6   :  { %159 = vmatpush1.msra.mxu1 %v21_v8  ;;  %v18_v14 = vld [vmem:[%s3178_s2 + $0x8] sm:$0xff]  ;;  %77 = vmatprep.subr.mxu0 %v28_v9  ;;  %v17_v16 = vld [vmem:[%s3178_s2] sm:$0xff]  ;;  %v2272_v22 = vld [vmem:[%s3180_s0 + $0x10] sm:$0xff]  ;;  %s2637_s2 = smov 8  }
   0x7   :  { %160 = vmatprep.subr.mxu1 %v20_v10  ;;  %78 = vmatpush1.msra.mxu0 %v27_v11  ;;  %v40_v17 = vld [vmem:[%s3179_s1] sm:$0xff]  ;;  %v41_v19 = vld [vmem:[%s3179_s1 + $0x8] sm:$0x7f]  ;;  %v2275_v23 = vld [vmem:[%s3179_s1 + $0x18] sm:$0x7f]  ;;  %s2631_s1 = smov 112  }
   0x8   :  { %161 = vmatpush1.msra.mxu1 %v19_v12  ;;  %v38_v18 = vld [vmem:[%s3180_s0] sm:$0xff]  ;;  %79 = vmatprep.subr.mxu0 %v26_v13  ;;  %v39_v20 = vld [vmem:[%s3180_s0 + $0x8] sm:$0x7f]  ;;  %v2273_v24 = vld [vmem:[%s3180_s0 + $0x18] sm:$0x7f]  ;;  %s2630_s0 = smov 48  }
   0x9   :  { %162 = vmatprep.subr.mxu1 %v18_v14  ;;  %80 = vmatpush1.msra.mxu0 %v25_v15 }
   0xa   :  { %163 = vmatpush1.msra.mxu1 %v17_v16  ;;  %2268 = vmatmul.mubr.msk.f32.vlgmr.msra.gmra.mxu0 %vm42_vm0, %v40_v17 }
   0xb   :  { %2270 = vmatmul.mubr.msk.f32.vlgmr.msra.gmra.mxu1 %vm42_vm0, %v38_v18  ;;  %119 = vmatprep.mubr.f32.mxu0 %v2627_v3 }
   0xc   :  { %202 = vmatprep.mubr.f32.mxu1 %v2627_v3  ;;  %245 = vmatprep.subr.mxu0 %v32_v0 }
   0xd   :  { %328 = vmatprep.subr.mxu1 %v24_v1  ;;  %246 = vmatpush1.msra.mxu0 %v31_v2 }
   0xe   :  { %329 = vmatpush1.msra.mxu1 %v23_v4  ;;  %2269 = vmatmul.mubr.msk.f32.gmra.mxu0 %vm42_vm0, %v41_v19 }
   0xf   :  { %2271 = vmatmul.mubr.msk.f32.gmra.mxu1 %vm42_vm0, %v39_v20  ;;  %247 = vmatprep.subr.mxu0 %v30_v5 }
  0x10   :  { %330 = vmatprep.subr.mxu1 %v22_v6  ;;  %248 = vmatpush1.msra.mxu0 %v29_v7 }
  0x11   :  { %331 = vmatpush1.msra.mxu1 %v21_v8  ;;  %249 = vmatprep.subr.mxu0 %v28_v9 }
  0x12   :  { %332 = vmatprep.subr.mxu1 %v20_v10  ;;  %250 = vmatpush1.msra.mxu0 %v27_v11 }
  0x13   :  { %333 = vmatpush1.msra.mxu1 %v19_v12  ;;  %251 = vmatprep.subr.mxu0 %v26_v13 }
  0x14   :  { %334 = vmatprep.subr.mxu1 %v18_v14  ;;  %252 = vmatpush1.msra.mxu0 %v25_v15 }
  0x15   :  { %285 = vmatprep.mubr.f32.mxu0 %v2627_v3  ;;  %335 = vmatpush1.msra.mxu1 %v17_v16 }
  0x16   :  { %368 = vmatprep.mubr.f32.mxu1 %v2627_v3  ;;  %2276 = vmatmul.mubr.msk.f32.vlgmr.msra.gmra.mxu0 %vm42_vm0, %v2274_v21 }
  0x17   :  { %2278 = vmatmul.mubr.msk.f32.vlgmr.msra.gmra.mxu1 %vm42_vm0, %v2272_v22  ;;  %291 = vmatprep.mubr.f32.mxu0 %v2627_v3 }
  0x18   :  { %374 = vmatprep.mubr.f32.mxu1 %v2627_v3 }
  0x1a   :  { %2277 = vmatmul.mubr.msk.f32.gmra.mxu0 %vm42_vm0, %v2275_v23 }
  0x1b   :  { %2279 = vmatmul.mubr.msk.f32.gmra.mxu1 %vm42_vm0, %v2273_v24 }
  0xca   :  { %v115_v25 = vpop.f32.mrf.mxu0 }
  0xcb   :  { %v198_v26 = vpop.f32.mrf.mxu1 }
  0xcc   :  { %v199_v27 = vadd.f32 %v198_v26, %v115_v25  ;;  %v117_v28 = vpop.f32.mrf.mxu0 }
  0xcd   :  { %v200_v29 = vpop.f32.mrf.mxu1 }
  0xce   :  { %580 = vrot.lane.b32.xlu0 %v199_v27, %s2628_s10  ;;  %383 = vrot.lane.b32.xlu1 %v199_v27, %s2629_s11  ;;  %v121_v30 = vpop.f32.mrf.mxu0  ;;  %v2778_v40 = vadd.f32 %v200_v29, %v117_v28 }
  0xcf   :  { %2421 = vmatprep.mubr.msk.f32.mxu0 %vm395_vm1, %v199_v27  ;;  %v204_v31 = vpop.f32.mrf.mxu1 }
  0xd0   :  { %v2755_v32 = vadd.f32 %v204_v31, %v121_v30  ;;  %v123_v33 = vpop.f32.mrf.mxu0 }
  0xd1   :  { %v206_v34 = vpop.f32.mrf.mxu1 }
  0xd2   :  { %385 = vrot.lane.b32.xlu0 %v2755_v32, %s2629_s11  ;;  %483 = vrot.lane.b32.xlu1 %v199_v27, %s2630_s0  ;;  %v2780_v41 = vadd.f32 %v206_v34, %v123_v33 }
  0xd6   :  { %485 = vrot.lane.b32.xlu0 %v2755_v32, %s2630_s0  ;;  %479 = vrot.lane.b32.xlu1 %v199_v27, %s2631_s1  ;;  %v287_v35 = vpop.f32.mrf.mxu0 }
  0xd7   :  { %v370_v36 = vpop.f32.mrf.mxu1 }
  0xd8   :  { %v289_v37 = vpop.f32.mrf.mxu0  ;;  %v2798_v42 = vadd.f32 %v370_v36, %v287_v35 }
  0xd9   :  { %v372_v38 = vpop.f32.mrf.mxu1 }
  0xda   :  { %582 = vrot.lane.b32.xlu0 %v2755_v32, %s2628_s10  ;;  %677 = vrot.lane.b32.xlu1 %v199_v27, %s2632_s12  ;;  %v2766_v39 = vadd.f32 %v372_v38, %v289_v37  ;;  %v293_v43 = vpop.f32.mrf.mxu0 }
  0xdb   :  { %v376_v44 = vpop.f32.mrf.mxu1 }
  0xdc   :  { %v2808_v45 = vadd.f32 %v376_v44, %v293_v43  ;;  %v2875_v15 = vpop.f32.mrf.mxu0 }
  0xdd   :  { %v2877_v18 = vpop.f32.mrf.mxu1 }
  0xde   :  { %679 = vrot.lane.b32.xlu0 %v2755_v32, %s2632_s12  ;;  %481 = vrot.lane.b32.xlu1 %v2755_v32, %s2631_s1 }
  0xe2   :  { %576 = vrot.lane.b32.xlu0 %v199_v27, %s2633_s13  ;;  %578 = vrot.lane.b32.xlu1 %v2755_v32, %s2633_s13 }
  0xe6   :  { %673 = vrot.lane.b32.xlu0 %v199_v27, %s2634_s14  ;;  %675 = vrot.lane.b32.xlu1 %v2755_v32, %s2634_s14 }
  0xea   :  { %389 = vrot.lane.b32.xlu0 %v2778_v40, %s2633_s13  ;;  %391 = vrot.lane.b32.xlu1 %v2780_v41, %s2633_s13 }
  0xee   :  { %487 = vrot.lane.b32.xlu0 %v2778_v40, %s2634_s14  ;;  %489 = vrot.lane.b32.xlu1 %v2780_v41, %s2634_s14 }
  0xf2   :  { %584 = vrot.lane.b32.xlu0 %v2778_v40, %s2629_s11  ;;  %586 = vrot.lane.b32.xlu1 %v2780_v41, %s2629_s11 }
  0xf6   :  { %681 = vrot.lane.b32.xlu0 %v2778_v40, %s2630_s0  ;;  %683 = vrot.lane.b32.xlu1 %v2780_v41, %s2630_s0 }
  0xfa   :  { %871 = vrot.lane.b32.xlu1 %v2798_v42, %s2630_s0  ;;  %772 = vrot.lane.b32.xlu0 %v2798_v42, %s2629_s11 }
  0xfe   :  { %867 = vrot.lane.b32.xlu1 %v2798_v42, %s2631_s1  ;;  %1065 = vrot.lane.b32.xlu0 %v2798_v42, %s2632_s12 }
 0x102   :  { %968 = vrot.lane.b32.xlu1 %v2798_v42, %s2628_s10  ;;  %774 = vrot.lane.b32.xlu0 %v2808_v45, %s2629_s11 }
 0x106   :  { %964 = vrot.lane.b32.xlu1 %v2798_v42, %s2633_s13  ;;  %970 = vrot.lane.b32.xlu0 %v2808_v45, %s2628_s10 }
 0x10a   :  { %873 = vrot.lane.b32.xlu1 %v2808_v45, %s2630_s0  ;;  %1067 = vrot.lane.b32.xlu0 %v2808_v45, %s2632_s12 }
 0x10e   :  { %869 = vrot.lane.b32.xlu0 %v2808_v45, %s2631_s1 }
 0x140   :  { %v581_v46 = vpop.permute.xlu0 %580  ;;  %v384_v47 = vpop.permute.xlu1 %383 }
 0x144   :  { %v386_v48 = vpop.permute.xlu0 %385  ;;  %v484_v49 = vpop.permute.xlu1 %483 }
 0x145   :  { %2417 = vmatprep.subr.msk.mxu0 %vm395_vm1, %v386_v48 }
 0x146   :  { %2418 = vmatpush3.xpose.msk.msra.mxu0 %vm395_vm1, %v386_v48 }
 0x147   :  { %2419 = vmatprep.subr.msk.mxu0 %vm395_vm1, %v384_v47 }
 0x148   :  { %v486_v50 = vpop.permute.xlu0 %485  ;;  %v480_v51 = vpop.permute.xlu1 %479 }
 0x149   :  { %2424 = vmatprep.subr.msk.mxu1 %vm395_vm1, %v486_v50  ;;  %2428 = vmatprep.mubr.msk.f32.mxu1 %vm395_vm1, %v480_v51 }
 0x14a   :  { %2420 = vmatpush3.xpose.msk.msra.mxu0 %vm395_vm1, %v384_v47  ;;  %2425 = vmatpush3.xpose.msk.msra.mxu1 %vm395_vm1, %v486_v50 }
 0x14b   :  { %2426 = vmatprep.subr.msk.mxu1 %vm395_vm1, %v484_v49 }
 0x14c   :  { %v583_v52 = vpop.permute.xlu0 %582  ;;  %v678_v53 = vpop.permute.xlu1 %677 }
 0x14d   :  { %2422 = vmatmul.mubr.msk.f32.vlgmr.msra.gmra.mxu0 %vm395_vm1, %v2755_v32  ;;  %2431 = vmatprep.subr.msk.mxu0 %vm395_vm1, %v583_v52 }
 0x14e   :  { %2427 = vmatpush3.xpose.msk.msra.mxu1 %vm395_vm1, %v484_v49  ;;  %2432 = vmatpush3.xpose.msk.msra.mxu0 %vm395_vm1, %v583_v52 }
 0x14f   :  { %2433 = vmatprep.subr.msk.mxu0 %vm395_vm1, %v581_v46 }
 0x150   :  { %v680_v54 = vpop.permute.xlu0 %679  ;;  %v482_v55 = vpop.permute.xlu1 %481 }
 0x151   :  { %2429 = vmatmul.mubr.msk.f32.vlgmr.msra.gmra.mxu1 %vm395_vm1, %v482_v55  ;;  %2438 = vmatprep.subr.msk.mxu1 %vm395_vm1, %v680_v54 }
 0x152   :  { %2434 = vmatpush3.xpose.msk.msra.mxu0 %vm395_vm1, %v581_v46  ;;  %2439 = vmatpush3.xpose.msk.msra.mxu1 %vm395_vm1, %v680_v54 }
 0x153   :  { %2440 = vmatprep.subr.msk.mxu1 %vm395_vm1, %v678_v53 }
 0x154   :  { %v577_v56 = vpop.permute.xlu0 %576  ;;  %v579_v57 = vpop.permute.xlu1 %578 }
 0x155   :  { %2435 = vmatprep.mubr.msk.f32.mxu0 %vm395_vm1, %v577_v56 }
 0x156   :  { %2436 = vmatmul.mubr.msk.f32.vlgmr.msra.gmra.mxu0 %vm395_vm1, %v579_v57  ;;  %2441 = vmatpush3.xpose.msk.msra.mxu1 %vm395_vm1, %v678_v53 }
 0x157   :  { %2449 = vmatprep.mubr.msk.f32.mxu0 %vm395_vm1, %v2798_v42 }
 0x158   :  { %v674_v58 = vpop.permute.xlu0 %673  ;;  %v676_v59 = vpop.permute.xlu1 %675 }
 0x159   :  { %2442 = vmatprep.mubr.msk.f32.mxu1 %vm395_vm1, %v674_v58 }
 0x15a   :  { %2443 = vmatmul.mubr.msk.f32.vlgmr.msra.gmra.mxu1 %vm395_vm1, %v676_v59 }
 0x15c   :  { %v390_v60 = vpop.permute.xlu0 %389  ;;  %v392_v61 = vpop.permute.xlu1 %391 }
 0x160   :  { %v488_v62 = vpop.permute.xlu0 %487  ;;  %v490_v63 = vpop.permute.xlu1 %489 }
 0x164   :  { %v585_v0 = vpop.permute.xlu0 %584  ;;  %v587_v1 = vpop.permute.xlu1 %586 }
 0x168   :  { %v2850_v2 = vpop.permute.xlu0 %681  ;;  %v684_v3 = vpop.permute.xlu1 %683 }
 0x16c   :  { %v872_v4 = vpop.permute.xlu1 %871  ;;  %v773_v5 = vpop.permute.xlu0 %772 }
 0x170   :  { %v868_v6 = vpop.permute.xlu1 %867  ;;  %v1066_v7 = vpop.permute.xlu0 %1065 }
 0x171   :  { %2456 = vmatprep.mubr.msk.f32.mxu1 %vm395_vm1, %v868_v6 }
 0x174   :  { %v969_v8 = vpop.permute.xlu1 %968  ;;  %v775_v9 = vpop.permute.xlu0 %774 }
 0x175   :  { %2445 = vmatprep.subr.msk.mxu0 %vm395_vm1, %v775_v9 }
 0x176   :  { %2446 = vmatpush3.xpose.msk.msra.mxu0 %vm395_vm1, %v775_v9 }
 0x177   :  { %2447 = vmatprep.subr.msk.mxu0 %vm395_vm1, %v773_v5 }
 0x178   :  { %v965_v10 = vpop.permute.xlu1 %964  ;;  %v971_v11 = vpop.permute.xlu0 %970 }
 0x17a   :  { %2448 = vmatpush3.xpose.msk.msra.mxu0 %vm395_vm1, %v773_v5 }
 0x17b   :  { %2459 = vmatprep.subr.msk.mxu0 %vm395_vm1, %v971_v11 }
 0x17c   :  { %v874_v12 = vpop.permute.xlu1 %873  ;;  %v1068_v13 = vpop.permute.xlu0 %1067 }
 0x17d   :  { %2452 = vmatprep.subr.msk.mxu1 %vm395_vm1, %v874_v12  ;;  %2450 = vmatmul.mubr.msk.f32.vlgmr.msra.gmra.mxu0 %vm395_vm1, %v2808_v45 }
 0x17e   :  { %2453 = vmatpush3.xpose.msk.msra.mxu1 %vm395_vm1, %v874_v12  ;;  %2460 = vmatpush3.xpose.msk.msra.mxu0 %vm395_vm1, %v971_v11 }
 0x17f   :  { %2454 = vmatprep.subr.msk.mxu1 %vm395_vm1, %v872_v4  ;;  %2461 = vmatprep.subr.msk.mxu0 %vm395_vm1, %v969_v8 }
 0x180   :  { %2463 = vmatprep.mubr.msk.f32.mxu0 %vm395_vm1, %v965_v10  ;;  %v870_v14 = vpop.permute.xlu0 %869 }
 0x182   :  { %2455 = vmatpush3.xpose.msk.msra.mxu1 %vm395_vm1, %v872_v4  ;;  %2462 = vmatpush3.xpose.msk.msra.mxu0 %vm395_vm1, %v969_v8 }
 0x183   :  { %2466 = vmatprep.subr.msk.mxu1 %vm395_vm1, %v1068_v13 }
 0x185   :  { %2457 = vmatmul.mubr.msk.f32.vlgmr.msra.gmra.mxu1 %vm395_vm1, %v870_v14 }
 0x186   :  { %2467 = vmatpush3.xpose.msk.msra.mxu1 %vm395_vm1, %v1068_v13 }
 0x187   :  { %2468 = vmatprep.subr.msk.mxu1 %vm395_vm1, %v1066_v7 }
 0x18a   :  { %2469 = vmatpush3.xpose.msk.msra.mxu1 %vm395_vm1, %v1066_v7 }
 0x18b   :  { %2473 = vmatprep.subr.msk.mxu1 %vm1342_vm2, %v2780_v41 }
 0x20d   :  { %v2423_v16 = vpop.f32.mrf.mxu0 }
 0x20e   :  { %v476_v17 = vadd.f32 %v2423_v16, %v392_v61 }
 0x20f   :  { %v470_v20 = vpop.f32.mrf.mxu0 }
 0x210   :  { %v1163_v19 = vsel %vm1162_vm3, %v476_v17, -inf  ;;  %v471_v24 = vadd.f32 %v470_v20, %v390_v60 }
 0x211   :  { %v2430_v21 = vpop.f32.mrf.mxu1  ;;  %1164 = vmax.xlane.f32.xlu1 %v1163_v19 }
 0x212   :  { %v573_v22 = vadd.f32 %v2430_v21, %v490_v63  ;;  %v1159_v31 = vsel %vm1158_vm4, %v471_v24, -inf }
 0x213   :  { %v567_v23 = vpop.f32.mrf.mxu1 }
 0x214   :  { %v568_v25 = vadd.f32 %v567_v23, %v488_v62  ;;  %v1169_v26 = vsel %vm1162_vm3, %v573_v22, -inf }
 0x215   :  { %1170 = vmax.xlane.f32.xlu0 %v1169_v26  ;;  %v2948_v26 = vadd.f32 %v2877_v18, %v2875_v15 }
 0x216   :  { %v2437_v27 = vpop.f32.mrf.mxu0  ;;  %v1166_v28 = vsel %vm1158_vm4, %v568_v25, -inf }
 0x217   :  { %v670_v29 = vadd.f32 %v2437_v27, %v587_v1  ;;  %1167 = vmax.xlane.f32.xlu1 %v1166_v28 }
 0x218   :  { %v664_v30 = vpop.f32.mrf.mxu0 }
 0x219   :  { %v665_v32 = vadd.f32 %v664_v30, %v585_v0  ;;  %1160 = vmax.xlane.f32.xlu0 %v1159_v31  ;;  %v1175_v33 = vsel %vm1162_vm3, %v670_v29, -inf }
 0x21a   :  { %v2444_v34 = vpop.f32.mrf.mxu1 }
 0x21b   :  { %v767_v35 = vadd.f32 %v2444_v34, %v684_v3  ;;  %1176 = vmax.xlane.f32.xlu1 %v1175_v33  ;;  %v1172_v36 = vsel %vm1158_vm4, %v665_v32, -inf }
 0x21c   :  { %v761_v37 = vpop.f32.mrf.mxu1 }
 0x21d   :  { %v762_v38 = vadd.f32 %v761_v37, %v2850_v2  ;;  %1173 = vmax.xlane.f32.xlu0 %v1172_v36  ;;  %v1181_v43 = vsel %vm1162_vm3, %v767_v35, -inf }
 0x21f   :  { %1182 = vmax.xlane.f32.xlu1 %v1181_v43  ;;  %v1178_v44 = vsel %vm1158_vm4, %v762_v38, -inf }
 0x221   :  { %1179 = vmax.xlane.f32.xlu0 %v1178_v44 }
 0x230   :  { %1061 = vrot.lane.b32.xlu1 %v2798_v42, %s2634_s14 }
 0x234   :  { %1063 = vrot.lane.b32.xlu1 %v2808_v45, %s2634_s14 }
 0x237   :  { %966 = vrot.lane.b32.xlu0 %v2808_v45, %s2633_s13 }
 0x238   :  { %1422 = vrot.lane.b32.xlu1 %v2780_v41, %s2635_s15 }
 0x23b   :  { %1420 = vrot.lane.b32.xlu0 %v2778_v40, %s2635_s15 }
 0x23c   :  { %1510 = vrot.lane.b32.xlu1 %v2780_v41, %s2631_s1 }
 0x23d   :  { %v2451_v37 = vpop.f32.mrf.mxu0 }
 0x240   :  { %1598 = vrot.lane.b32.xlu1 %v2780_v41, %s2636_s16 }
 0x29a   :  { %v1165_v42 = vpop.xlane.xlu1 %1164 }
 0x29b   :  { %v1209_v46 = vsub.f32 %v476_v17, %v1165_v42 }
 0x29d   :  { %v1226_v47 = vmul.f32 1.442695, %v1209_v46 }
 0x29e   :  { %v1171_v48 = vpop.xlane.xlu0 %1170 }
 0x29f   :  { %2563 = vpow2.f32 %v1226_v47  ;;  %v1211_v45 = vsub.f32 %v573_v22, %v1171_v48 }
 0x2a0   :  { %v1168_v49 = vpop.xlane.xlu1 %1167 }
 0x2a1   :  { %v1230_v50 = vmul.f32 1.442695, %v1211_v45  ;;  %v1210_v51 = vsub.f32 %v568_v25, %v1168_v49  ;;  %v2458_v49 = vpop.f32.mrf.mxu1 }
 0x2a2   :  { %v1161_v52 = vpop.xlane.xlu0 %1160 }
 0x2a3   :  { %2565 = vpow2.f32 %v1230_v50  ;;  %v1208_v53 = vsub.f32 %v471_v24, %v1161_v52  ;;  %v1228_v55 = vmul.f32 1.442695, %v1210_v51  ;;  %v858_v52 = vpop.f32.mrf.mxu0 }
 0x2a4   :  { %v1177_v54 = vpop.xlane.xlu1 %1176 }
 0x2a5   :  { %v1224_v56 = vmul.f32 1.442695, %v1208_v53  ;;  %v1213_v57 = vsub.f32 %v670_v29, %v1177_v54 }
 0x2a6   :  { %v1174_v58 = vpop.xlane.xlu0 %1173 }
 0x2a7   :  { %2567 = vpow2.f32 %v1224_v56  ;;  %v1212_v59 = vsub.f32 %v665_v32, %v1174_v58  ;;  %v1234_v61 = vmul.f32 1.442695, %v1213_v57 }
 0x2a8   :  { %v1183_v60 = vpop.xlane.xlu1 %1182  ;;  %2569 = vpow2.f32 %v1228_v55 }
 0x2a9   :  { %v1232_v62 = vmul.f32 1.442695, %v1212_v59  ;;  %v1215_v63 = vsub.f32 %v767_v35, %v1183_v60  ;;  %v955_v59 = vpop.f32.mrf.mxu1 }
 0x2aa   :  { %v1180_v0 = vpop.xlane.xlu0 %1179 }
 0x2ab   :  { %2571 = vpow2.f32 %v1232_v62  ;;  %v1214_v1 = vsub.f32 %v762_v38, %v1180_v0  ;;  %v1238_v4 = vmul.f32 1.442695, %v1215_v63 }
 0x2ac   :  { %v2902_v2 = vpop.eup %2563  ;;  %v1062_v3 = vpop.permute.xlu1 %1061  ;;  %2573 = vpow2.f32 %v1234_v61 }
 0x2ad   :  { %v1236_v5 = vmul.f32 1.442695, %v1214_v1  ;;  %2470 = vmatprep.mubr.msk.f32.mxu1 %vm395_vm1, %v1062_v3  ;;  %v1259_v6 = vsel %vm1162_vm3, %v2902_v2, 0.0 }
 0x2ae   :  { %1260 = vadd.xlane.f32.xlu1 %v1259_v6  ;;  %v967_v7 = vpop.permute.xlu0 %966 }
 0x2af   :  { %2575 = vpow2.f32 %v1236_v5  ;;  %2464 = vmatmul.mubr.msk.f32.vlgmr.msra.gmra.mxu0 %vm395_vm1, %v967_v7 }
 0x2b0   :  { %v2908_v8 = vpop.eup %2565  ;;  %v1064_v9 = vpop.permute.xlu1 %1063  ;;  %2577 = vpow2.f32 %v1238_v4 }
 0x2b1   :  { %2471 = vmatmul.mubr.msk.f32.vlgmr.msra.gmra.mxu1 %vm395_vm1, %v1064_v9  ;;  %v1265_v10 = vsel %vm1162_vm3, %v2908_v8, 0.0 }
 0x2b2   :  { %2474 = vmatpush3.msk.msra.mxu1 %vm1342_vm2, %v2780_v41  ;;  %1266 = vadd.xlane.f32.xlu0 %v1265_v10  ;;  %v1421_v15 = vpop.permute.xlu0 %1420 }
 0x2b3   :  { %2475 = vmatprep.subr.mxu1 %v2778_v40 }
 0x2b4   :  { %v2568_v11 = vpop.eup %2567  ;;  %2476 = vmatpush3.msra.mxu1 %v2778_v40  ;;  %v2917_v12 = vpop.permute.xlu1 %1422 }
 0x2b5   :  { %2480 = vmatprep.subr.msk.mxu1 %vm1342_vm2, %v2917_v12  ;;  %v1256_v13 = vsel %vm1158_vm4, %v2568_v11, 0.0  ;;  %v2922_v14 = vpop.eup %2569 }
 0x2b6   :  { %1257 = vadd.xlane.f32.xlu0 %v1256_v13  ;;  %v1262_v41 = vsel %vm1158_vm4, %v2922_v14, 0.0 }
 0x2b8   :  { %v2924_v16 = vpop.eup %2571  ;;  %v1511_v17 = vpop.permute.xlu1 %1510 }
 0x2b9   :  { %2487 = vmatprep.subr.msk.mxu0 %vm1342_vm2, %v1511_v17  ;;  %v1268_v19 = vsel %vm1158_vm4, %v2924_v16, 0.0  ;;  %v2931_v20 = vpop.eup %2573 }
 0x2ba   :  { %1263 = vadd.xlane.f32.xlu0 %v1262_v41  ;;  %1269 = vadd.xlane.f32.xlu1 %v1268_v19  ;;  %v1271_v22 = vsel %vm1162_vm3, %v2931_v20, 0.0 }
 0x2bb   :  { %2488 = vmatpush3.msk.msra.mxu0 %vm1342_vm2, %v1511_v17 }
 0x2bc   :  { %v2934_v21 = vpop.eup %2575 }
 0x2bd   :  { %v1274_v23 = vsel %vm1158_vm4, %v2934_v21, 0.0  ;;  %v2940_v24 = vpop.eup %2577 }
 0x2be   :  { %1272 = vadd.xlane.f32.xlu0 %v1271_v22  ;;  %1275 = vadd.xlane.f32.xlu1 %v1274_v23  ;;  %v1277_v25 = vsel %vm1162_vm3, %v2940_v24, 0.0 }
 0x2c2   :  { %1278 = vadd.xlane.f32.xlu0 %v1277_v25  ;;  %v3029_v25 = vld [vmem:[%s3181_s3 + $0x10] sm:$0xff] }
 0x2cf   :  { %1596 = vrot.lane.b32.xlu1 %v2778_v40, %s2636_s16 }
 0x2d3   :  { %780 = vrot.lane.b32.xlu1 %v2948_v26, %s2633_s13 }
 0x2d7   :  { %877 = vrot.lane.b32.xlu1 %v2948_v26, %s2634_s14 }
 0x2d8   :  { %1508 = vrot.lane.b32.xlu0 %v2778_v40, %s2631_s1  ;;  %v1599_v40 = vpop.permute.xlu1 %1598 }
 0x2db   :  { %974 = vrot.lane.b32.xlu1 %v2948_v26, %s2629_s11 }
 0x2dc   :  { %778 = vrot.lane.b32.xlu0 %v2766_v39, %s2633_s13 }
 0x2df   :  { %1071 = vrot.lane.b32.xlu1 %v2948_v26, %s2630_s0 }
 0x2e0   :  { %875 = vrot.lane.b32.xlu0 %v2766_v39, %s2634_s14 }
 0x2e4   :  { %972 = vrot.lane.b32.xlu0 %v2766_v39, %s2629_s11 }
 0x2e8   :  { %1069 = vrot.lane.b32.xlu0 %v2766_v39, %s2630_s0 }
 0x337   :  { %v1261_v27 = vpop.xlane.xlu1 %1260 }
 0x338   :  { %2579 = vrcp.f32 %v1261_v27 }
 0x33b   :  { %v1267_v18 = vpop.xlane.xlu0 %1266 }
 0x33f   :  { %v1258_v28 = vpop.xlane.xlu0 %1257 }
 0x340   :  { %2581 = vrcp.f32 %v1258_v28 }
 0x341   :  { %2583 = vrcp.f32 %v1267_v18 }
 0x343   :  { %v1270_v29 = vpop.xlane.xlu1 %1269  ;;  %v1264_v30 = vpop.xlane.xlu0 %1263 }
 0x344   :  { %2585 = vrcp.f32 %v1270_v29 }
 0x345   :  { %2587 = vrcp.f32 %v1264_v30  ;;  %v2580_v35 = vpop.eup %2579 }
 0x346   :  { %v1321_v42 = vmul.f32 %v2580_v35, %v2902_v2 }
 0x347   :  { %v1276_v31 = vpop.xlane.xlu1 %1275  ;;  %v1273_v32 = vpop.xlane.xlu0 %1272 }
 0x348   :  { %2589 = vrcp.f32 %v1276_v31 }
 0x349   :  { %2591 = vrcp.f32 %v1273_v32 }
 0x34b   :  { %v1597_v33 = vpop.permute.xlu1 %1596  ;;  %v1279_v34 = vpop.xlane.xlu0 %1278 }
 0x34c   :  { %2593 = vrcp.f32 %v1279_v34 }
 0x34d   :  { %v2582_v36 = vpop.eup %2581 }
 0x34e   :  { %v1320_v38 = vmul.f32 %v2582_v36, %v2568_v11  ;;  %v2584_v46 = vpop.eup %2583 }
 0x34f   :  { %v781_v43 = vpop.permute.xlu1 %780  ;;  %v1509_v44 = vpop.permute.xlu0 %1508  ;;  %v1323_v56 = vmul.f32 %v2584_v46, %v2908_v8 }
 0x350   :  { %v2969_v47 = vadd.f32 %v2451_v37, %v781_v43  ;;  %2477 = vmatprep.mubr.msk.f32.mxu1 %vm1158_vm4, %v1320_v38  ;;  %2489 = vmatprep.subr.mxu0 %v1509_v44 }
 0x351   :  { %v2586_v48 = vpop.eup %2585  ;;  %2478 = vmatmul.mubr.msk.f32.vlgmr.msra.gmra.mxu1 %vm1158_vm4, %v1321_v42  ;;  %2490 = vmatpush3.msra.mxu0 %v1509_v44 }
 0x352   :  { %v2588_v45 = vpop.eup %2587  ;;  %2481 = vmatpush3.msk.msra.mxu1 %vm1342_vm2, %v2917_v12  ;;  %v1187_v50 = vsel %vm1162_vm3, %v2969_v47, -inf  ;;  %v1324_v51 = vmul.f32 %v2586_v48, %v2924_v16 }
 0x353   :  { %2482 = vmatprep.subr.mxu1 %v1421_v15  ;;  %1188 = vmax.xlane.f32.xlu1 %v1187_v50  ;;  %v779_v53 = vpop.permute.xlu0 %778  ;;  %v1322_v54 = vmul.f32 %v2588_v45, %v2922_v14  ;;  %v878_v62 = vpop.permute.xlu1 %877 }
 0x354   :  { %2483 = vmatpush3.msra.mxu1 %v1421_v15  ;;  %v2979_v55 = vadd.f32 %v858_v52, %v779_v53  ;;  %2491 = vmatprep.mubr.msk.f32.mxu0 %vm1158_vm4, %v1324_v51  ;;  %v961_v3 = vadd.f32 %v2458_v49, %v878_v62  ;;  %v3036_v15 = vld [vmem:[%s3181_s3 + $0x8] sm:$0xff] }
 0x355   :  { %v2590_v57 = vpop.eup %2589  ;;  %2484 = vmatprep.mubr.msk.f32.mxu1 %vm1158_vm4, %v1322_v54  ;;  %2494 = vmatprep.subr.msk.mxu1 %vm1342_vm2, %v1599_v40 }
 0x356   :  { %v2592_v58 = vpop.eup %2591  ;;  %2485 = vmatmul.mubr.msk.f32.vlgmr.msra.gmra.mxu1 %vm1158_vm4, %v1323_v56  ;;  %v1184_v60 = vsel %vm1158_vm4, %v2979_v55, -inf  ;;  %v1326_v61 = vmul.f32 %v2590_v57, %v2934_v21  ;;  %v1193_v6 = vsel %vm1162_vm3, %v961_v3, -inf }
 0x357   :  { %2495 = vmatpush3.msk.msra.mxu1 %vm1342_vm2, %v1599_v40  ;;  %1185 = vmax.xlane.f32.xlu0 %v1184_v60  ;;  %v876_v63 = vpop.permute.xlu0 %875  ;;  %v1325_v0 = vmul.f32 %v2592_v58, %v2931_v20  ;;  %v975_v7 = vpop.permute.xlu1 %974  ;;  %v3043_v40 = vld [vmem:[%s3181_s3] sm:$0xff] }
 0x358   :  { %2496 = vmatprep.subr.mxu1 %v1597_v33  ;;  %v956_v1 = vadd.f32 %v955_v59, %v876_v63  ;;  %2498 = vmatprep.mubr.msk.f32.mxu1 %vm1158_vm4, %v1326_v61 }
 0x359   :  { %v2594_v2 = vpop.eup %2593  ;;  %2497 = vmatpush3.msra.mxu1 %v1597_v33  ;;  %2492 = vmatmul.mubr.msk.f32.vlgmr.msra.gmra.mxu0 %vm1158_vm4, %v1325_v0 }
 0x35a   :  { %2512 = vmatprep.subr.msk.mxu1 %vm1342_vm2, %v2948_v26  ;;  %v1190_v4 = vsel %vm1158_vm4, %v956_v1, -inf  ;;  %v1327_v5 = vmul.f32 %v2594_v2, %v2940_v24  ;;  %v3022_v24 = vld [vmem:[%s3181_s3 + $0x18] sm:$0xff] }
 0x35b   :  { %1191 = vmax.xlane.f32.xlu0 %v1190_v4  ;;  %v973_v8 = vpop.permute.xlu0 %972  ;;  %v1072_v10 = vpop.permute.xlu1 %1071  ;;  %2501 = vmatprep.subr.mxu0 %v3022_v24 }
 0x35c   :  { %2499 = vmatmul.mubr.msk.f32.vlgmr.msra.gmra.mxu1 %vm1158_vm4, %v1327_v5  ;;  %2502 = vmatpush3.msra.mxu0 %v3022_v24 }
 0x35d   :  { %2513 = vmatpush3.msk.msra.mxu1 %vm1342_vm2, %v2948_v26  ;;  %2503 = vmatprep.subr.mxu0 %v3029_v25 }
 0x35e   :  { %2514 = vmatprep.subr.mxu1 %v2766_v39  ;;  %2504 = vmatpush3.msra.mxu0 %v3029_v25 }
 0x35f   :  { %2515 = vmatpush3.msra.mxu1 %v2766_v39  ;;  %1194 = vmax.xlane.f32.xlu0 %v1193_v6  ;;  %v1070_v41 = vpop.permute.xlu0 %1069 }
 0x360   :  { %2505 = vmatprep.subr.mxu0 %v3036_v15 }
 0x361   :  { %2506 = vmatpush3.msra.mxu0 %v3036_v15 }
 0x362   :  { %2507 = vmatprep.subr.mxu0 %v3043_v40 }
 0x363   :  { %2508 = vmatpush3.msra.mxu0 %v3043_v40 }
 0x36f   :  { %v2465_v9 = vpop.f32.mrf.mxu0 }
 0x370   :  { %v3003_v11 = vadd.f32 %v2465_v9, %v975_v7 }
 0x371   :  { %v1052_v12 = vpop.f32.mrf.mxu0  ;;  %v2472_v13 = vpop.f32.mrf.mxu1 }
 0x372   :  { %v3005_v14 = vadd.f32 %v1052_v12, %v973_v8  ;;  %v3007_v16 = vadd.f32 %v2472_v13, %v1072_v10  ;;  %v1199_v17 = vsel %vm1162_vm3, %v3003_v11, -inf }
 0x373   :  { %v1149_v19 = vpop.f32.mrf.mxu1  ;;  %1200 = vmax.xlane.f32.xlu0 %v1199_v17 }
 0x374   :  { %v3011_v20 = vadd.f32 %v1149_v19, %v1070_v41  ;;  %v1196_v21 = vsel %vm1158_vm4, %v3005_v14, -inf  ;;  %v1205_v22 = vsel %vm1162_vm3, %v3007_v16, -inf }
 0x375   :  { %1197 = vmax.xlane.f32.xlu1 %v1196_v21 }
 0x376   :  { %v1202_v23 = vsel %vm1158_vm4, %v3011_v20, -inf }
 0x377   :  { %1206 = vmax.xlane.f32.xlu0 %v1205_v22 }
 0x379   :  { %1203 = vmax.xlane.f32.xlu1 %v1202_v23 }
 0x38a   :  { %1886 = vrot.lane.b32.xlu1 %v2948_v26, %s2635_s15 }
 0x38d   :  { %1974 = vrot.lane.b32.xlu0 %v2948_v26, %s2631_s1 }
 0x38e   :  { %1884 = vrot.lane.b32.xlu1 %v2766_v39, %s2635_s15 }
 0x3dc   :  { %v1189_v18 = vpop.xlane.xlu1 %1188 }
 0x3dd   :  { %v1217_v27 = vsub.f32 %v2969_v47, %v1189_v18 }
 0x3df   :  { %v1242_v28 = vmul.f32 1.442695, %v1217_v27 }
 0x3e0   :  { %v1186_v29 = vpop.xlane.xlu0 %1185 }
 0x3e1   :  { %2595 = vpow2.f32 %v1242_v28  ;;  %v1216_v30 = vsub.f32 %v2979_v55, %v1186_v29 }
 0x3e3   :  { %v1240_v31 = vmul.f32 1.442695, %v1216_v30 }
 0x3e4   :  { %v1192_v32 = vpop.xlane.xlu0 %1191 }
 0x3e5   :  { %2597 = vpow2.f32 %v1240_v31  ;;  %v1218_v33 = vsub.f32 %v956_v1, %v1192_v32 }
 0x3e7   :  { %v1244_v34 = vmul.f32 1.442695, %v1218_v33 }
 0x3e8   :  { %v1195_v35 = vpop.xlane.xlu0 %1194 }
 0x3e9   :  { %2599 = vpow2.f32 %v1244_v34  ;;  %v1219_v36 = vsub.f32 %v961_v3, %v1195_v35 }
 0x3eb   :  { %v1246_v37 = vmul.f32 1.442695, %v1219_v36 }
 0x3ed   :  { %2601 = vpow2.f32 %v1246_v37 }
 0x3ee   :  { %v3055_v38 = vpop.eup %2595 }
 0x3ef   :  { %v1283_v43 = vsel %vm1162_vm3, %v3055_v38, 0.0 }
 0x3f0   :  { %1284 = vadd.xlane.f32.xlu0 %v1283_v43 }
 0x3f2   :  { %v3059_v44 = vpop.eup %2597 }
 0x3f3   :  { %v1280_v42 = vsel %vm1158_vm4, %v3059_v44, 0.0 }
 0x3f4   :  { %1281 = vadd.xlane.f32.xlu1 %v1280_v42 }
 0x3f6   :  { %v3063_v46 = vpop.eup %2599 }
 0x3f7   :  { %v1286_v47 = vsel %vm1158_vm4, %v3063_v46, 0.0 }
 0x3f8   :  { %1287 = vadd.xlane.f32.xlu1 %v1286_v47 }
 0x3fa   :  { %v3067_v48 = vpop.eup %2601 }
 0x3fb   :  { %v1289_v45 = vsel %vm1162_vm3, %v3067_v48, 0.0 }
 0x3fc   :  { %1290 = vadd.xlane.f32.xlu0 %v1289_v45  ;;  %v1201_v49 = vpop.xlane.xlu0 %1200 }
 0x3fd   :  { %v1221_v50 = vsub.f32 %v3003_v11, %v1201_v49 }
 0x3fe   :  { %v1198_v51 = vpop.xlane.xlu1 %1197 }
 0x3ff   :  { %v1250_v52 = vmul.f32 1.442695, %v1221_v50  ;;  %v1220_v53 = vsub.f32 %v3005_v14, %v1198_v51 }
 0x400   :  { %v1207_v54 = vpop.xlane.xlu0 %1206 }
 0x401   :  { %2603 = vpow2.f32 %v1250_v52  ;;  %v1248_v55 = vmul.f32 1.442695, %v1220_v53  ;;  %v1223_v56 = vsub.f32 %v3007_v16, %v1207_v54 }
 0x402   :  { %v1204_v57 = vpop.xlane.xlu1 %1203 }
 0x403   :  { %2605 = vpow2.f32 %v1248_v55  ;;  %v1254_v58 = vmul.f32 1.442695, %v1223_v56  ;;  %v1222_v59 = vsub.f32 %v3011_v20, %v1204_v57 }
 0x404   :  { %v3075_v60 = vpop.permute.xlu0 %1974 }
 0x405   :  { %2607 = vpow2.f32 %v1254_v58  ;;  %v1252_v61 = vmul.f32 1.442695, %v1222_v59  ;;  %2526 = vmatprep.subr.msk.mxu0 %vm1342_vm2, %v3075_v60 }
 0x406   :  { %v1887_v62 = vpop.permute.xlu1 %1886 }
 0x407   :  { %2609 = vpow2.f32 %v1252_v61  ;;  %2519 = vmatprep.subr.msk.mxu1 %vm1342_vm2, %v1887_v62 }
 0x40a   :  { %v1885_v16 = vpop.permute.xlu1 %1884 }
 0x40e   :  { %v3080_v63 = vpop.eup %2603 }
 0x40f   :  { %v1295_v0 = vsel %vm1162_vm3, %v3080_v63, 0.0 }
 0x410   :  { %v3084_v1 = vpop.eup %2605  ;;  %1296 = vadd.xlane.f32.xlu0 %v1295_v0 }
 0x411   :  { %v1292_v2 = vsel %vm1158_vm4, %v3084_v1, 0.0  ;;  %v2479_v7 = vpop.f32.mrf.mxu1 }
 0x412   :  { %v3088_v3 = vpop.eup %2607  ;;  %1293 = vadd.xlane.f32.xlu1 %v1292_v2 }
 0x413   :  { %v1301_v4 = vsel %vm1162_vm3, %v3088_v3, 0.0  ;;  %v1411_v8 = vpop.f32.mrf.mxu1 }
 0x414   :  { %v3092_v5 = vpop.eup %2609  ;;  %1302 = vadd.xlane.f32.xlu0 %v1301_v4 }
 0x415   :  { %v1298_v6 = vsel %vm1158_vm4, %v3092_v5, 0.0 }
 0x416   :  { %1299 = vadd.xlane.f32.xlu1 %v1298_v6  ;;  %v2486_v9 = vpop.f32.mrf.mxu1 }
 0x418   :  { %v1499_v10 = vpop.f32.mrf.mxu1 }
 0x419   :  { %v2493_v11 = vpop.f32.mrf.mxu0 }
 0x41b   :  { %v1587_v12 = vpop.f32.mrf.mxu0 }
 0x41c   :  { %v2500_v13 = vpop.f32.mrf.mxu1 }
 0x41e   :  { %v1675_v14 = vpop.f32.mrf.mxu1 }
 0x427   :  { %1686 = vrot.lane.b32.xlu1 %v1499_v10, %s2637_s2 }
 0x42a   :  { %1688 = vrot.lane.b32.xlu0 %v2486_v9, %s2637_s2 }
 0x42b   :  { %1694 = vrot.lane.b32.xlu1 %v1587_v12, %s2632_s12 }
 0x42e   :  { %1696 = vrot.lane.b32.xlu0 %v2493_v11, %s2632_s12 }
 0x42f   :  { %1702 = vrot.lane.b32.xlu1 %v1675_v14, %s2638_s25 }
 0x432   :  { %1704 = vrot.lane.b32.xlu0 %v2500_v13, %s2638_s25 }
 0x433   :  { %2062 = vrot.lane.b32.xlu1 %v2948_v26, %s2636_s16 }
 0x436   :  { %1972 = vrot.lane.b32.xlu0 %v2766_v39, %s2631_s1 }
 0x437   :  { %2060 = vrot.lane.b32.xlu1 %v2766_v39, %s2636_s16 }
 0x479   :  { %v1285_v17 = vpop.xlane.xlu0 %1284 }
 0x47a   :  { %2611 = vrcp.f32 %v1285_v17 }
 0x47d   :  { %v1282_v41 = vpop.xlane.xlu1 %1281 }
 0x47e   :  { %2613 = vrcp.f32 %v1282_v41 }
 0x481   :  { %v1288_v19 = vpop.xlane.xlu1 %1287 }
 0x482   :  { %2615 = vrcp.f32 %v1288_v19 }
 0x485   :  { %v1291_v20 = vpop.xlane.xlu0 %1290 }
 0x486   :  { %2617 = vrcp.f32 %v1291_v20 }
 0x487   :  { %v2612_v21 = vpop.eup %2611 }
 0x488   :  { %v1329_v26 = vmul.f32 %v2612_v21, %v3055_v38 }
 0x48b   :  { %v2614_v22 = vpop.eup %2613 }
 0x48c   :  { %v1328_v23 = vmul.f32 %v2614_v22, %v3059_v44 }
 0x48e   :  { %2516 = vmatprep.mubr.msk.f32.mxu1 %vm1158_vm4, %v1328_v23 }
 0x48f   :  { %v2616_v18 = vpop.eup %2615  ;;  %2517 = vmatmul.mubr.msk.f32.vlgmr.msra.gmra.mxu1 %vm1158_vm4, %v1329_v26 }
 0x490   :  { %2520 = vmatpush3.msk.msra.mxu1 %vm1342_vm2, %v1887_v62  ;;  %v1330_v39 = vmul.f32 %v2616_v18, %v3063_v46 }
 0x491   :  { %2521 = vmatprep.subr.mxu1 %v1885_v16 }
 0x492   :  { %2522 = vmatpush3.msra.mxu1 %v1885_v16  ;;  %2523 = vmatprep.mubr.msk.f32.mxu1 %vm1158_vm4, %v1330_v39 }
 0x493   :  { %v2618_v27 = vpop.eup %2617 }
 0x494   :  { %v1331_v28 = vmul.f32 %v2618_v27, %v3067_v48 }
 0x496   :  { %2524 = vmatmul.mubr.msk.f32.vlgmr.msra.gmra.mxu1 %vm1158_vm4, %v1331_v28 }
 0x499   :  { %v1297_v29 = vpop.xlane.xlu0 %1296 }
 0x49b   :  { %v1294_v30 = vpop.xlane.xlu1 %1293 }
 0x49c   :  { %2619 = vrcp.f32 %v1294_v30 }
 0x49d   :  { %v1303_v31 = vpop.xlane.xlu0 %1302  ;;  %2621 = vrcp.f32 %v1297_v29 }
 0x49f   :  { %v1300_v32 = vpop.xlane.xlu1 %1299 }
 0x4a0   :  { %2623 = vrcp.f32 %v1300_v32 }
 0x4a1   :  { %v1689_v33 = vpop.permute.xlu0 %1688  ;;  %2625 = vrcp.f32 %v1303_v31 }
 0x4a2   :  { %v1710_v44 = vsel %vm1708_vm5, %v2479_v7, %v1689_v33 }
 0x4a3   :  { %v1687_v34 = vpop.permute.xlu1 %1686 }
 0x4a4   :  { %v1709_v43 = vsel %vm1708_vm5, %v1411_v8, %v1687_v34 }
 0x4a5   :  { %v1697_v35 = vpop.permute.xlu0 %1696 }
 0x4a6   :  { %v1712_v48 = vsel %vm395_vm1, %v1710_v44, %v1697_v35 }
 0x4a7   :  { %v1695_v36 = vpop.permute.xlu1 %1694 }
 0x4a8   :  { %v1711_v42 = vsel %vm395_vm1, %v1709_v43, %v1695_v36 }
 0x4a9   :  { %v1705_v37 = vpop.permute.xlu0 %1704  ;;  %v2620_v38 = vpop.eup %2619 }
 0x4aa   :  { %v2622_v47 = vpop.eup %2621  ;;  %v1715_v50 = vsel %vm1713_vm6, %v1712_v48, %v1705_v37  ;;  %v1332_v52 = vmul.f32 %v2620_v38, %v3084_v1 }
 0x4ab   :  { %v1703_v46 = vpop.permute.xlu1 %1702  ;;  %v1333_v55 = vmul.f32 %v2622_v47, %v3080_v63 }
 0x4ac   :  { %v1714_v45 = vsel %vm1713_vm6, %v1711_v42, %v1703_v46 }
 0x4ad   :  { %v2624_v49 = vpop.eup %2623  ;;  %2509 = vmatprep.mubr.msk.f32.mxu0 %vm42_vm0, %v1714_v45  ;;  %v1973_v51 = vpop.permute.xlu0 %1972 }
 0x4ae   :  { %2510 = vmatmul.mubr.msk.f32.vlgmr.msra.gmra.mxu0 %vm42_vm0, %v1715_v50  ;;  %v1334_v53 = vmul.f32 %v2624_v49, %v3092_v5  ;;  %v2626_v56 = vpop.eup %2625 }
 0x4af   :  { %2527 = vmatpush3.msk.msra.mxu0 %vm1342_vm2, %v3075_v60  ;;  %v2063_v54 = vpop.permute.xlu1 %2062  ;;  %2530 = vmatprep.mubr.msk.f32.mxu0 %vm1158_vm4, %v1332_v52  ;;  %v1335_v58 = vmul.f32 %v2626_v56, %v3088_v3 }
 0x4b0   :  { %2528 = vmatprep.subr.mxu0 %v1973_v51  ;;  %2533 = vmatprep.subr.msk.mxu1 %vm1342_vm2, %v2063_v54 }
 0x4b1   :  { %2529 = vmatpush3.msra.mxu0 %v1973_v51  ;;  %2537 = vmatprep.mubr.msk.f32.mxu1 %vm1158_vm4, %v1334_v53 }
 0x4b2   :  { %2534 = vmatpush3.msk.msra.mxu1 %vm1342_vm2, %v2063_v54  ;;  %2531 = vmatmul.mubr.msk.f32.vlgmr.msra.gmra.mxu0 %vm1158_vm4, %v1333_v55 }
 0x4b3   :  { %v2061_v57 = vpop.permute.xlu1 %2060  ;;  %2540 = vmatprep.subr.mxu0 %v3022_v24 }
 0x4b4   :  { %2535 = vmatprep.subr.mxu1 %v2061_v57  ;;  %2541 = vmatpush3.msra.mxu0 %v3022_v24 }
 0x4b5   :  { %2536 = vmatpush3.msra.mxu1 %v2061_v57  ;;  %2542 = vmatprep.subr.mxu0 %v3029_v25 }
 0x4b6   :  { %2538 = vmatmul.mubr.msk.f32.vlgmr.msra.gmra.mxu1 %vm1158_vm4, %v1335_v58  ;;  %2543 = vmatpush3.msra.mxu0 %v3029_v25  ;;  %v2324_v25 = vld [vmem:[%s3181_s3 + $0x20] ss:$0 sm:$0xff] }
 0x4b7   :  { %2544 = vmatprep.subr.mxu0 %v3036_v15 }
 0x4b8   :  { %2545 = vmatpush3.msra.mxu0 %v3036_v15 }
 0x4b9   :  { %2546 = vmatprep.subr.mxu0 %v3043_v40 }
 0x4ba   :  { %2547 = vmatpush3.msra.mxu0 %v3043_v40 }
 0x54f   :  { %v2518_v59 = vpop.f32.mrf.mxu1 }
 0x551   :  { %v1875_v60 = vpop.f32.mrf.mxu1 }
 0x556   :  { %v2525_v61 = vpop.f32.mrf.mxu1 }
 0x557   :  { %2152 = vrot.lane.b32.xlu1 %v2525_v61, %s2637_s2 }
 0x558   :  { %v1963_v24 = vpop.f32.mrf.mxu1 }
 0x559   :  { %2150 = vrot.lane.b32.xlu0 %v1963_v24, %s2637_s2 }
 0x56e   :  { %v2511_v62 = vpop.f32.mrf.mxu0 }
 0x56f   :  { %v1798_v63 = vadd.f32 %v2511_v62, %v2324_v25 }
 0x570   :  { %v1792_v15 = vpop.f32.mrf.mxu0 }
 0x571   :  { %2261 = vst.msk [vmem:[%s3182_s4 + $0x8] sm:$0x7f] %vm2260_vm7, %v1798_v63  ;;  %v1793_v40 = vadd.f32 %v2324_v25, %v1792_v15 }
 0x572   :  { %v2532_v0 = vpop.f32.mrf.mxu0 }
 0x573   :  { %2259 = vst.msk [vmem:[%s3182_s4] sm:$0xff] %vm42_vm0, %v1793_v40  ;;  %2160 = vrot.lane.b32.xlu1 %v2532_v0, %s2632_s12 }
 0x574   :  { %v2051_v1 = vpop.f32.mrf.mxu0 }
 0x575   :  { %2158 = vrot.lane.b32.xlu0 %v2051_v1, %s2632_s12 }
 0x576   :  { %v2539_v2 = vpop.f32.mrf.mxu1 }
 0x577   :  { %2168 = vrot.lane.b32.xlu1 %v2539_v2, %s2638_s25 }
 0x578   :  { %v2139_v3 = vpop.f32.mrf.mxu1 }
 0x579   :  { %2166 = vrot.lane.b32.xlu0 %v2139_v3, %s2638_s25 }
 0x5c9   :  { %v2153_v4 = vpop.permute.xlu1 %2152 }
 0x5ca   :  { %v2173_v10 = vsel %vm1708_vm5, %v2518_v59, %v2153_v4 }
 0x5cb   :  { %v2151_v5 = vpop.permute.xlu0 %2150 }
 0x5cc   :  { %v2172_v8 = vsel %vm1708_vm5, %v1875_v60, %v2151_v5 }
 0x5e5   :  { %v2161_v6 = vpop.permute.xlu1 %2160 }
 0x5e6   :  { %v2175_v13 = vsel %vm395_vm1, %v2173_v10, %v2161_v6 }
 0x5e7   :  { %v2159_v7 = vpop.permute.xlu0 %2158 }
 0x5e8   :  { %v2174_v11 = vsel %vm395_vm1, %v2172_v8, %v2159_v7 }
 0x5e9   :  { %v2169_v9 = vpop.permute.xlu1 %2168 }
 0x5ea   :  { %v2177_v16 = vsel %vm1713_vm6, %v2175_v13, %v2169_v9 }
 0x5eb   :  { %v2167_v12 = vpop.permute.xlu0 %2166 }
 0x5ec   :  { %v2176_v14 = vsel %vm1713_vm6, %v2174_v11, %v2167_v12 }
 0x5ed   :  { %2548 = vmatprep.mubr.msk.f32.mxu0 %vm42_vm0, %v2176_v14 }
 0x5ee   :  { %2549 = vmatmul.mubr.msk.f32.vlgmr.msra.gmra.mxu0 %vm42_vm0, %v2177_v16 }
 0x6ae   :  { %v2550_v17 = vpop.f32.mrf.mxu0 }
 0x6af   :  { %v2256_v41 = vadd.f32 %v2550_v17, %v2324_v25 }
 0x6b0   :  { %v2250_v19 = vpop.f32.mrf.mxu0 }
 0x6b1   :  { %2263 = vst.msk [vmem:[%s3182_s4 + $0x18] sm:$0x7f] %vm2260_vm7, %v2256_v41  ;;  %v2251_v20 = vadd.f32 %v2324_v25, %v2250_v19 }
 0x6b3   :  { %2262 = vst.msk [vmem:[%s3182_s4 + $0x10] sm:$0xff] %vm42_vm0, %v2251_v20 }

</bundles_post_ra>
